<compile_context>
chip_gen: v7x
topology: tpu7x:2x2x1
jax: 0.10.0
libtpu: 0.0.40
codegen_flags: <defaults>
</compile_context>

<pallas_src>
import functools

import jax
import jax.numpy as jnp
from jax.experimental import pallas as pl
from jax.experimental.pallas import tpu as pltpu


_LANE = 128
_SUBLANE = 8
_FMA_K_THRESHOLD = 8  # below this contraction depth, layer 1 uses VPU FMAs


def _round_up(v, m):
    return ((v + m - 1) // m) * m


def _is_multi_tensorcore():
    """True on parts exposing >1 TensorCore per device (v4/v5p megacore, v7x)."""
    try:
        kind = jax.devices()[0].device_kind.lower()
    except Exception:
        return False
    return any(tag in kind for tag in ("v4", "v5p", "v7"))


def _mlp_kernel(x_ref, w1_ref, b1_ref, w2_ref, b2_ref, w3_ref, b3_ref, o_ref):
    """Fused forward: relu(x@W1+b1) -> relu(.@W2+b2) -> .@W3+b3.

    Weights/biases are VMEM-resident (constant block index).  Hidden dim is
    pre-padded to 128 lanes; the output stays narrow (= output_dim).
    """
    x = x_ref[...]                       # (blk, K) float32
    k_dim = x_ref.shape[1]

    # ---- layer 1 -----------------------------------------------------------
    if k_dim <= _FMA_K_THRESHOLD:
        # K is tiny (2 here): a K-deep matmul would waste the systolic array.
        # Do K broadcast-multiply-adds on the VPU instead (f32, exact).
        w1 = w1_ref[...]                 # (K, Hp) f32
        h1 = x[:, 0:1] * w1[0:1, :]
        for k in range(1, k_dim):
            h1 = h1 + x[:, k:k + 1] * w1[k:k + 1, :]
    else:
        h1 = jnp.dot(x.astype(jnp.bfloat16),
                     w1_ref[...].astype(jnp.bfloat16),
                     preferred_element_type=jnp.float32)
    h1 = jnp.maximum(h1 + b1_ref[...], 0.0)

    # ---- layer 2 (MXU, bf16 operands, f32 accumulate) ------------------------
    h2 = jnp.dot(h1.astype(jnp.bfloat16), w2_ref[...],
                 preferred_element_type=jnp.float32)
    h2 = jnp.maximum(h2 + b2_ref[...], 0.0)

    # ---- layer 3 (MXU, narrow output) ----------------------------------------
    out = jnp.dot(h2.astype(jnp.bfloat16), w3_ref[...],
                  preferred_element_type=jnp.float32)
    o_ref[...] = (out + b3_ref[...]).astype(o_ref.dtype)


def prepare_params(params):
    """One-time pad/cast of the weights. Call at param-load time, not per step.

    Input params use PyTorch Linear semantics but stored transposed to
    (in, out): w1 (in, h), b1 (1, h), w2 (h, h), b2 (1, h), w3 (h, out),
    b3 (1, out).
    """
    w1, b1 = params["w1"], params["b1"]
    w2, b2 = params["w2"], params["b2"]
    w3, b3 = params["w3"], params["b3"]
    n_hidden = w1.shape[1]
    ph = _round_up(n_hidden, _LANE) - n_hidden  # hidden dim pad to 128 lanes
    return {
        # layer 1 stays f32 (VPU FMA path; exact, and v5e has no bf16 VALU)
        "w1": jnp.pad(w1.astype(jnp.float32), ((0, 0), (0, ph))),
        "b1": jnp.pad(b1.astype(jnp.float32), ((0, 0), (0, ph))),
        # layers 2/3 feed the MXU in bf16; accumulation stays f32 in-kernel
        "w2": jnp.pad(w2, ((0, ph), (0, ph))).astype(jnp.bfloat16),
        "b2": jnp.pad(b2.astype(jnp.float32), ((0, 0), (0, ph))),
        # output columns stay narrow (= output_dim): small HBM writeback,
        # no post-kernel column slice
        "w3": jnp.pad(w3, ((0, ph), (0, 0))).astype(jnp.bfloat16),
        "b3": b3.astype(jnp.float32),
    }


@functools.partial(jax.jit, static_argnames=("block_b",))
def linear_classifier_forward(x, prepared, block_b=2048):
    """Fused forward pass. `prepared` comes from prepare_params()."""
    w1, b1 = prepared["w1"], prepared["b1"]
    w2, b2 = prepared["w2"], prepared["b2"]
    w3, b3 = prepared["w3"], prepared["b3"]

    B, input_dim = x.shape
    output_dim = w3.shape[1]

    # --- pick the batch tile -------------------------------------------------
    b8 = _round_up(max(B, 1), _SUBLANE)
    blk = min(_round_up(block_b, _SUBLANE), b8)
    if _is_multi_tensorcore() and b8 >= 2 * _SUBLANE and (b8 // blk) < 2:
        # two balanced, sublane-aligned halves so both TensorCores get equal work
        blk = _round_up((b8 + 1) // 2, _SUBLANE)
    b_pad = _round_up(b8, blk)
    xp = jnp.pad(x, ((0, b_pad - B), (0, 0))) if b_pad != B else x

    grid = (b_pad // blk,)

    def resident(shape):
        # constant block index -> stays VMEM-resident across all grid steps
        return pl.BlockSpec(shape, lambda i: (0,) * len(shape))

    out = pl.pallas_call(
        _mlp_kernel,
        out_shape=jax.ShapeDtypeStruct((b_pad, output_dim), jnp.float32),
        grid_spec=pltpu.PrefetchScalarGridSpec(
            num_scalar_prefetch=0,
            grid=grid,
            in_specs=[
                pl.BlockSpec((blk, input_dim), lambda i: (i, 0)),  # x tile
                resident(w1.shape),
                resident(b1.shape),
                resident(w2.shape),
                resident(b2.shape),
                resident(w3.shape),
                resident(b3.shape),
            ],
            out_specs=pl.BlockSpec((blk, output_dim), lambda i: (i, 0)),
        ),
        compiler_params=pltpu.CompilerParams(
            dimension_semantics=("parallel",),
        ),
    )(xp, w1, b1, w2, b2, w3, b3)

    return out[:B] if b_pad != B else out


def init_params(key, input_dim=2, output_dim=22, n_hidden=50):
    """Deterministic synthetic init (PyTorch Linear shapes, stored transposed)."""
    ks = jax.random.split(key, 6)

    def linear(kw, kb, fan_in, fan_out):
        bound = 1.0 / jnp.sqrt(fan_in)
        # PyTorch stores weight as (out, in); we keep the transposed (in, out).
        w = jax.random.uniform(kw, (fan_in, fan_out), jnp.float32, -bound, bound)
        b = jax.random.uniform(kb, (1, fan_out), jnp.float32, -bound, bound)
        return w, b

    w1, b1 = linear(ks[0], ks[1], input_dim, n_hidden)
    w2, b2 = linear(ks[2], ks[3], n_hidden, n_hidden)
    w3, b3 = linear(ks[4], ks[5], n_hidden, output_dim)
    return {"w1": w1, "b1": b1, "w2": w2, "b2": b2, "w3": w3, "b3": b3}


def reference_forward(x, params):
    hi = jax.lax.Precision.HIGHEST
    h1 = jnp.maximum(jnp.dot(x, params["w1"], precision=hi) + params["b1"], 0.0)
    h2 = jnp.maximum(jnp.dot(h1, params["w2"], precision=hi) + params["b2"], 0.0)
    return jnp.dot(h2, params["w3"], precision=hi) + params["b3"]


if __name__ == "__main__":
    key = jax.random.PRNGKey(0)
    k_param, k_x = jax.random.split(key)

    input_dim, output_dim, n_hidden = 2, 22, 50
    batch = 16

    params = init_params(k_param, input_dim, output_dim, n_hidden)
    prepared = prepare_params(params)          # one-time pad/cast
    x = jax.random.normal(k_x, (batch, input_dim), jnp.float32)

    out = linear_classifier_forward(x, prepared)
    out = jax.block_until_ready(out)

    ref = reference_forward(x, params)
    assert out.shape == (batch, output_dim)
    # layers 2/3 use bf16 MXU operands (f32 accumulate) -> ~1e-2 level tolerance
    assert jnp.allclose(out, ref, atol=2e-2, rtol=2e-2), "mismatch vs reference"

    print("KERNEL_OK")
</pallas_src>

<mosaic_0001>
module attributes {stable_mosaic.version = 11 : i64} {
  func.func @_mlp_kernel(%arg0: i32, %arg1: memref<16x2xf32, #tpu.memory_space<vmem>>, %arg2: memref<2x128xf32, #tpu.memory_space<vmem>>, %arg3: memref<1x128xf32, #tpu.memory_space<vmem>>, %arg4: memref<128x128xbf16, #tpu.memory_space<vmem>>, %arg5: memref<1x128xf32, #tpu.memory_space<vmem>>, %arg6: memref<128x22xbf16, #tpu.memory_space<vmem>>, %arg7: memref<1x22xf32, #tpu.memory_space<vmem>>, %arg8: memref<16x22xf32, #tpu.memory_space<vmem>>) attributes {dimension_semantics = [#tpu.dimension_semantics<parallel>], iteration_bounds = array<i64: 1>, scalar_prefetch = 0 : i64, scratch_operands = 0 : i64, tpu.core_type = #tpu.core_type<tc>, window_params = [{transform_indices = @transform_0, window_bounds = array<i64: 16, 2>}, {pipeline_mode = #tpu.pipeline_mode<synchronous>, transform_indices = @transform_1, window_bounds = array<i64: 2, 128>}, {pipeline_mode = #tpu.pipeline_mode<synchronous>, transform_indices = @transform_2, window_bounds = array<i64: 1, 128>}, {pipeline_mode = #tpu.pipeline_mode<synchronous>, transform_indices = @transform_3, window_bounds = array<i64: 128, 128>}, {pipeline_mode = #tpu.pipeline_mode<synchronous>, transform_indices = @transform_4, window_bounds = array<i64: 1, 128>}, {pipeline_mode = #tpu.pipeline_mode<synchronous>, transform_indices = @transform_5, window_bounds = array<i64: 128, 22>}, {pipeline_mode = #tpu.pipeline_mode<synchronous>, transform_indices = @transform_6, window_bounds = array<i64: 1, 22>}, {transform_indices = @transform_7, window_bounds = array<i64: 16, 22>}]} {
    %c0 = arith.constant 0 : index
    %c0_0 = arith.constant 0 : index
    %0 = vector.load %arg1[%c0, %c0_0] : memref<16x2xf32, #tpu.memory_space<vmem>>, vector<16x2xf32>
    %c0_1 = arith.constant 0 : index
    %c0_2 = arith.constant 0 : index
    %1 = vector.load %arg2[%c0_1, %c0_2] : memref<2x128xf32, #tpu.memory_space<vmem>>, vector<2x128xf32>
    %2 = vector.extract_strided_slice %0 {offsets = [0, 0], sizes = [16, 1], strides = [1, 1]} : vector<16x2xf32> to vector<16x1xf32>
    %3 = vector.extract_strided_slice %1 {offsets = [0, 0], sizes = [1, 128], strides = [1, 1]} : vector<2x128xf32> to vector<1x128xf32>
    %4 = vector.broadcast %2 : vector<16x1xf32> to vector<16x128xf32>
    %5 = vector.broadcast %3 : vector<1x128xf32> to vector<16x128xf32>
    %6 = arith.mulf %4, %5 : vector<16x128xf32>
    %7 = vector.extract_strided_slice %0 {offsets = [0, 1], sizes = [16, 1], strides = [1, 1]} : vector<16x2xf32> to vector<16x1xf32>
    %8 = vector.extract_strided_slice %1 {offsets = [1, 0], sizes = [1, 128], strides = [1, 1]} : vector<2x128xf32> to vector<1x128xf32>
    %9 = vector.broadcast %7 : vector<16x1xf32> to vector<16x128xf32>
    %10 = vector.broadcast %8 : vector<1x128xf32> to vector<16x128xf32>
    %11 = arith.mulf %9, %10 : vector<16x128xf32>
    %12 = arith.addf %6, %11 : vector<16x128xf32>
    %c0_3 = arith.constant 0 : index
    %c0_4 = arith.constant 0 : index
    %13 = vector.load %arg3[%c0_3, %c0_4] : memref<1x128xf32, #tpu.memory_space<vmem>>, vector<1x128xf32>
    %14 = vector.broadcast %13 : vector<1x128xf32> to vector<16x128xf32>
    %15 = arith.addf %12, %14 : vector<16x128xf32>
    %cst = arith.constant 0.000000e+00 : f32
    %16 = vector.broadcast %cst : f32 to vector<16x128xf32>
    %17 = arith.maximumf %15, %16 : vector<16x128xf32>
    %18 = arith.truncf %17 : vector<16x128xf32> to vector<16x128xbf16>
    %c0_5 = arith.constant 0 : index
    %c0_6 = arith.constant 0 : index
    %19 = vector.load %arg4[%c0_5, %c0_6] : memref<128x128xbf16, #tpu.memory_space<vmem>>, vector<128x128xbf16>
    %cst_7 = arith.constant dense<0.000000e+00> : vector<16x128xf32>
    %20 = tpu.matmul %18, %19, %cst_7 {dimension_numbers = #tpu.dot_dimension_numbers<[1], [0], [0], [1], [0, 0, 1, 1], [], []>} : vector<16x128xbf16>, vector<128x128xbf16>, vector<16x128xf32> -> vector<16x128xf32>
    %c0_8 = arith.constant 0 : index
    %c0_9 = arith.constant 0 : index
    %21 = vector.load %arg5[%c0_8, %c0_9] : memref<1x128xf32, #tpu.memory_space<vmem>>, vector<1x128xf32>
    %22 = vector.broadcast %21 : vector<1x128xf32> to vector<16x128xf32>
    %23 = arith.addf %20, %22 : vector<16x128xf32>
    %cst_10 = arith.constant 0.000000e+00 : f32
    %24 = vector.broadcast %cst_10 : f32 to vector<16x128xf32>
    %25 = arith.maximumf %23, %24 : vector<16x128xf32>
    %26 = arith.truncf %25 : vector<16x128xf32> to vector<16x128xbf16>
    %c0_11 = arith.constant 0 : index
    %c0_12 = arith.constant 0 : index
    %27 = vector.load %arg6[%c0_11, %c0_12] : memref<128x22xbf16, #tpu.memory_space<vmem>>, vector<128x22xbf16>
    %cst_13 = arith.constant dense<0.000000e+00> : vector<16x22xf32>
    %28 = tpu.matmul %26, %27, %cst_13 {dimension_numbers = #tpu.dot_dimension_numbers<[1], [0], [0], [1], [0, 0, 1, 1], [], []>} : vector<16x128xbf16>, vector<128x22xbf16>, vector<16x22xf32> -> vector<16x22xf32>
    %c0_14 = arith.constant 0 : index
    %c0_15 = arith.constant 0 : index
    %29 = vector.load %arg7[%c0_14, %c0_15] : memref<1x22xf32, #tpu.memory_space<vmem>>, vector<1x22xf32>
    %30 = vector.broadcast %29 : vector<1x22xf32> to vector<16x22xf32>
    %31 = arith.addf %28, %30 : vector<16x22xf32>
    %c0_16 = arith.constant 0 : index
    %c0_17 = arith.constant 0 : index
    %32 = vector.load %arg8[%c0_16, %c0_17] : memref<16x22xf32, #tpu.memory_space<vmem>>, vector<16x22xf32>
    tpu.vector_store %arg8[%c0_16, %c0_17], %31 {strides = array<i32>} : memref<16x22xf32, #tpu.memory_space<vmem>>, vector<16x22xf32>,
    return
  }
  func.func @transform_0(%arg0: i32) -> (i32, i32) {
    %c0_i32 = arith.constant 0 : i32
    %c0_i32_0 = arith.constant 0 : i32
    return %arg0, %c0_i32 : i32, i32
  }
  func.func @transform_1(%arg0: i32) -> (i32, i32) {
    %c0_i32 = arith.constant 0 : i32
    %c0_i32_0 = arith.constant 0 : i32
    %c0_i32_1 = arith.constant 0 : i32
    return %c0_i32, %c0_i32_0 : i32, i32
  }
  func.func @transform_2(%arg0: i32) -> (i32, i32) {
    %c0_i32 = arith.constant 0 : i32
    %c0_i32_0 = arith.constant 0 : i32
    %c0_i32_1 = arith.constant 0 : i32
    return %c0_i32, %c0_i32_0 : i32, i32
  }
  func.func @transform_3(%arg0: i32) -> (i32, i32) {
    %c0_i32 = arith.constant 0 : i32
    %c0_i32_0 = arith.constant 0 : i32
    %c0_i32_1 = arith.constant 0 : i32
    return %c0_i32, %c0_i32_0 : i32, i32
  }
  func.func @transform_4(%arg0: i32) -> (i32, i32) {
    %c0_i32 = arith.constant 0 : i32
    %c0_i32_0 = arith.constant 0 : i32
    %c0_i32_1 = arith.constant 0 : i32
    return %c0_i32, %c0_i32_0 : i32, i32
  }
  func.func @transform_5(%arg0: i32) -> (i32, i32) {
    %c0_i32 = arith.constant 0 : i32
    %c0_i32_0 = arith.constant 0 : i32
    %c0_i32_1 = arith.constant 0 : i32
    return %c0_i32, %c0_i32_0 : i32, i32
  }
  func.func @transform_6(%arg0: i32) -> (i32, i32) {
    %c0_i32 = arith.constant 0 : i32
    %c0_i32_0 = arith.constant 0 : i32
    %c0_i32_1 = arith.constant 0 : i32
    return %c0_i32, %c0_i32_0 : i32, i32
  }
  func.func @transform_7(%arg0: i32) -> (i32, i32) {
    %c0_i32 = arith.constant 0 : i32
    %c0_i32_0 = arith.constant 0 : i32
    return %arg0, %c0_i32 : i32, i32
  }
}

</mosaic_0001>

<bundles_post_ra>
// kernel: linear_classifier_forward.1
= control target key start
LH: loop header
LB: loop body
LE: loop exit
PB: predicated region body
PF: predicated region fallthrough
CT: control target
= control target key end

     0   :  { %v448_v2 = vmov 1   ;;  %v449_v3 = vmov 0   ;;  %v450_v5 = vmov 0.0   ;;  %vm451_vm0 = vmmov 0   ;;  %s591_s0 = inlined_call_operand.vmem [shape: f32[16,2], index: 0, kind: input, shape index: {}]   ;;  %s592_s1 = inlined_call_operand.vmem [shape: f32[2,128], index: 1, kind: input, shape index: {}]   ;;  %s593_s2 = inlined_call_operand.vmem [shape: f32[1,128], index: 2, kind: input, shape index: {}]   ;;  %s594_s3 = inlined_call_operand.vmem [shape: bf16[128,128], index: 3, kind: input, shape index: {}]   ;;  %s595_s4 = inlined_call_operand.vmem [shape: f32[1,128], index: 4, kind: input, shape index: {}]   ;;  %s596_s5 = inlined_call_operand.vmem [shape: bf16[128,22], index: 5, kind: input, shape index: {}]   ;;  %s597_s6 = inlined_call_operand.vmem [shape: f32[1,22], index: 6, kind: input, shape index: {}]   ;;  %s598_s7 = inlined_call_operand.hbm [shape: f32[16,22], index: 7, kind: output, shape index: {}]  }
   0x1   :  { %v28_v0 = vld [vmem:[%s591_s0] sm:$0xff]  ;;  %406 = vset.pattern.permute.xlu1 %v448_v2  ;;  %405 = vset.pattern.permute.xlu0 %v449_v3  ;;  %v29_v4 = vld [vmem:[%s591_s0 + $0x8] sm:$0xff]  ;;  %v410_v7 = vld [vmem:[%s594_s3 + $0x10] sm:$0xff]  }
   0x2   :  { %v408_v1 = vld [vmem:[%s594_s3] sm:$0xff]   ;;  %48 = vperm.xlu1 %406, %v28_v0   ;;  %33 = vperm.xlu0 %405, %v28_v0   ;;  %v409_v6 = vld [vmem:[%s594_s3 + $0x8] sm:$0xff]   ;;  %v411_v8 = vld [vmem:[%s594_s3 + $0x18] sm:$0xff]  }
   0x3   :  { %358 = vmatprep.subr.bf16.mxu0 %v450_v5  ;;  %378 = vmatprep.subr.bf16.mxu1 %v450_v5 }
   0x4   :  { %359 = vmatpush3.bf16.msra.mxu0 %v408_v1  ;;  %374 = vmatprep.mubr.msk.bf16.mxu0 %vm451_vm0, %v450_v5 }
   0x5   :  { %360 = vmatprep.subr.bf16.mxu0 %v450_v5  ;;  %394 = vmatprep.mubr.msk.bf16.mxu1 %vm451_vm0, %v450_v5 }
   0x6   :  { %52 = vperm.xlu1 %406, %v29_v4   ;;  %38 = vperm.xlu0 %405, %v29_v4  }
   0x8   :  { %361 = vmatpush3.bf16.msra.mxu0 %v409_v6 }
   0x9   :  { %362 = vmatprep.subr.bf16.mxu0 %v450_v5 }
   0xa   :  { %407 = vset.pattern.permute.xlu0 %v448_v2 }
   0xc   :  { %363 = vmatpush3.bf16.msra.mxu0 %v410_v7 }
   0xd   :  { %364 = vmatprep.subr.bf16.mxu0 %v450_v5 }
   0xe   :  { %12 = vsyncpa [#allocation3], 0  ;;  %v412_v9 = vld [vmem:[%s594_s3 + $0x20] sm:$0xff]   ;;  %v417_v11 = vld [vmem:[%s596_s5 + $0x8] sm:$0xff]   ;;  %v41_v19 = vlaneseq  ;;  %vm302_vm1 = vcmask 179200  }
   0xf   :  { %v416_v10 = vld [vmem:[%s596_s5] sm:$0xff]   ;;  %v413_v12 = vld [vmem:[%s594_s3 + $0x28] sm:$0xff]   ;;  %v418_v13 = vld [vmem:[%s596_s5 + $0x10] sm:$0xff]  }
  0x10   :  { %365 = vmatpush3.bf16.msra.mxu0 %v411_v8  ;;  %379 = vmatpush3.bf16.msra.mxu1 %v416_v10  ;;  %v414_v14 = vld [vmem:[%s594_s3 + $0x30] sm:$0xff]   ;;  %v419_v15 = vld [vmem:[%s596_s5 + $0x18] sm:$0xff]   ;;  %v420_v17 = vld [vmem:[%s596_s5 + $0x20] sm:$0xff]   ;;  %v42_v20 = vshrl.u32 %v41_v19, 7 }
  0x11   :  { %366 = vmatprep.subr.bf16.mxu0 %v450_v5  ;;  %380 = vmatprep.subr.bf16.mxu1 %v450_v5  ;;  %v415_v16 = vld [vmem:[%s594_s3 + $0x38] sm:$0xff]   ;;  %v421_v18 = vld [vmem:[%s596_s5 + $0x28] sm:$0xff]   ;;  %v30_v23 = vld [vmem:[%s592_s1] sm:$0x3] }
  0x12   :  { %v57_v21 = vsub.s32 1, %v42_v20  ;;  %v43_v22 = vsub.s32 0, %v42_v20  ;;  %v321_v31 = vld [vmem:[%s593_s2] ss:$0 sm:$0xff]  ;;  %v422_v42 = vld [vmem:[%s596_s5 + $0x30] sm:$0xff]   ;;  %v423_v43 = vld [vmem:[%s596_s5 + $0x38] sm:$0xff]  }
  0x13   :  { %v322_v44 = vld [vmem:[%s595_s4] ss:$0 sm:$0xff]  ;;  %s452_s5 = smov [#allocation2]  }
  0x14   :  { %367 = vmatpush3.bf16.msra.mxu0 %v412_v9  ;;  %381 = vmatpush3.bf16.msra.mxu1 %v417_v11  ;;  %v58_v24 = vrot.slane %v30_v23, %v57_v21  ;;  %v44_v25 = vrot.slane %v30_v23, %v43_v22  ;;  %v331_v54 = vld [vmem:[%s597_s6] ss:$0 sm:$0xff]  ;;  %s310_s17 = sshll.u32 %s452_s5, 4  ;;  %s311_s17 = int_to_ptr.vmem [resolvable:$true] %s310_s17 }
  0x15   :  { %368 = vmatprep.subr.bf16.mxu0 %v450_v5  ;;  %382 = vmatprep.subr.bf16.mxu1 %v450_v5  ;;  %s424_s4 = scalar_lea.vmem %s311_s17, 256  ;;  %p429_p1 = scmp.lt.s32.totalorder %s311_s17, %s311_s17 }
  0x16   :  { %p425_p0 = scmp.ne.s32.totalorder %s311_s17, %s424_s4  ;;  %p430_p2 = scmp.lt.s32.totalorder %s424_s4, %s424_s4 }
  0x18   :  { %369 = vmatpush3.bf16.msra.mxu0 %v413_v12  ;;  %383 = vmatpush3.bf16.msra.mxu1 %v418_v13  ;;  %p431_p3 = por %p430_p2, %p429_p1 }
  0x19   :  { %370 = vmatprep.subr.bf16.mxu0 %v450_v5  ;;  %384 = vmatprep.subr.bf16.mxu1 %v450_v5 }
  0x1a   :  { %p432_p4 = pnand %p431_p3, %p425_p0 }
  0x1c   :  { %371 = vmatpush3.bf16.msra.mxu0 %v414_v14  ;;  %385 = vmatpush3.bf16.msra.mxu1 %v419_v15 }
  0x1d   :  { %372 = vmatprep.subr.bf16.mxu0 %v450_v5  ;;  %386 = vmatprep.subr.bf16.mxu1 %v450_v5 }
  0x20   :  { %373 = vmatpush3.bf16.msra.mxu0 %v415_v16  ;;  %387 = vmatpush3.bf16.msra.mxu1 %v420_v17 }
  0x21   :  { %388 = vmatprep.subr.bf16.mxu1 %v450_v5 }
  0x24   :  { %389 = vmatpush3.bf16.msra.mxu1 %v421_v18 }
  0x25   :  { %390 = vmatprep.subr.bf16.mxu1 %v450_v5 }
  0x28   :  { %391 = vmatpush3.bf16.msra.mxu1 %v422_v42 }
  0x29   :  { %392 = vmatprep.subr.bf16.mxu1 %v450_v5 }
  0x2c   :  { %393 = vmatpush3.bf16.msra.mxu1 %v423_v43 }
  0x81   :  { %v49_v26 = vpop.permute.xlu1 %48  ;;  %v34_v27 = vpop.permute.xlu0 %33 }
  0x82   :  { %v59_v28 = vmul.f32 %v58_v24, %v49_v26  ;;  %v45_v29 = vmul.f32 %v44_v25, %v34_v27 }
  0x84   :  { %v61_v30 = vadd.f32 %v59_v28, %v45_v29 }
  0x85   :  { %v53_v32 = vpop.permute.xlu1 %52  ;;  %v39_v33 = vpop.permute.xlu0 %38 }
  0x86   :  { %v60_v34 = vmul.f32 %v58_v24, %v53_v32  ;;  %v46_v35 = vmul.f32 %v44_v25, %v39_v33  ;;  %v70_v36 = vadd.f32 %v321_v31, %v61_v30 }
  0x88   :  { %v62_v37 = vadd.f32 %v60_v34, %v46_v35  ;;  %v72_v39 = vmax.f32 %v70_v36, 0.0 }
  0x8a   :  { %v71_v38 = vadd.f32 %v321_v31, %v62_v37 }
  0x8c   :  { %v73_v40 = vmax.f32 %v71_v38, 0.0 }
  0x8e   :  { %v74_v41 = vpack.c.bf16 %v73_v40, %v72_v39 }
  0x90   :  { %375 = vmatmul.mubr.bf16.vlgmr.msra.gmra.mrb[0].mxu0 %v74_v41 }
 0x163   :  { %v180_v45 = vpop.f32.mrb[0].mxu0 }
 0x164   :  { %v181_v46 = vadd.f32 %v322_v44, %v180_v45  ;;  %v376_v47 = vpop.f32.mrb[1].mxu0 }
 0x165   :  { %v183_v48 = vpop.f32.mrb[2].mxu0 }
 0x166   :  { %v184_v49 = vadd.f32 %v322_v44, %v183_v48  ;;  %v377_v50 = vpop.f32.mrb[3].mxu0  ;;  %v187_v51 = vmax.f32 %v181_v46, 0.0 }
 0x168   :  { %v188_v52 = vmax.f32 %v184_v49, 0.0 }
 0x16a   :  { %v189_v53 = vpack.c.bf16 %v188_v52, %v187_v51 }
 0x16c   :  { %395 = vmatmul.mubr.bf16.vlgmr.msra.gmra.mrb[0].mxu1 %v189_v53 }
 0x23f   :  { %v295_v55 = vpop.f32.mrb[0].mxu1 }
 0x240   :  { %v296_v56 = vadd.f32 %v331_v54, %v295_v55  ;;  %v396_v57 = vpop.f32.mrb[1].mxu1 }
 0x241   :  { %v298_v58 = vpop.f32.mrb[2].mxu1 }
 0x242   :  { %303 = vst.msk [vmem:[#allocation2] sm:$0xff] %vm302_vm1, %v296_v56  ;;  %v299_v59 = vadd.f32 %v331_v54, %v298_v58  ;;  %v397_v60 = vpop.f32.mrb[3].mxu1 }
 0x244   :  { %304 = vst.msk [vmem:[#allocation2 + $0x8] sm:$0xff] %vm302_vm1, %v299_v59 }
 0x245   :  { %435 = shalt.err (!%p432_p4)
}
 0x246   :  { %s436_s19 = scalar_lea.hbm %s598_s7, 256 }
 0x247   :  { %p437_p5 = scmp.ne.s32.totalorder %s598_s7, %s436_s19  ;;  %p440_p6 = scmp.lt.u32.totalorder %s436_s19, %s598_s7 }
 0x249   :  { %p442_p7 = pnand %p440_p6, %p437_p5 }
 0x24b   :  { %445 = shalt.err (!%p442_p7)
}
 0x24c   :  { %s453_s24 = smov 128   ;;  %s454_s25 = smov 8  }
 0x24d   :  { %316 = dma.vmem_to_hbm [thread:$0]  %s311_s17, 256, %s598_s7, [#allocation3], %s453_s24, %s453_s24, %s454_s25  }
 0x24e   :  { %446 = dma.done.wait [#allocation3], 256  }
 0x24f   :  { %447 = vsyncadd [#allocation3], 4294967040 }
 0x250   :  { %320 = vsyncpa [#allocation3], 1 }

</bundles_post_ra>
